<compile_context>
chip_gen: v6e
topology: v6e:2x2x1
jax: 0.10.0
libtpu: 0.0.40
codegen_flags: <defaults>
</compile_context>

<pallas_src>
import jax
import jax.numpy as jnp
from jax.experimental import pallas as pl
from jax.experimental.pallas import tpu as pltpu

IN_FEATURES = 28 * 28          # 784
K_PAD = 896                    # 7 * 128: contraction axis padded to whole lane tiles
HIDDEN = 128
NUM_LABELS = 10
OUT_PAD = 128                  # lane-dense logits block (multiple of 128 lanes)


def _round_up(x, m):
    return (x + m - 1) // m * m


def _mlp_kernel(x_ref, w1_ref, b1_ref, w2_ref, b2_ref, logits_ref):
    """One batch tile: logits = relu(x @ W1 + b1) @ W2 + b2.

    x_ref      : (TB, 896)   bf16  (zero-padded 784 -> 896)
    w1_ref     : (896, 128)  bf16  (VMEM-resident across grid steps)
    b1_ref     : (1, 128)    f32
    w2_ref     : (128, 128)  bf16  (output lanes zero-padded 10 -> 128)
    b2_ref     : (1, 128)    f32   (lanes >= 10 are zero)
    logits_ref : (TB, 128)   f32   (lanes >= 10 ignored by the wrapper)
    """
    # Linear 1: bf16 MXU matmul with f32 accumulation; bias + ReLU in f32 (VPU).
    h = jnp.dot(x_ref[...], w1_ref[...], preferred_element_type=jnp.float32)
    h = jnp.maximum(h + b1_ref[...], 0.0)
    # TODO(synk): Dropout(0.2) is identity in eval mode; training-mode dropout
    # (pltpu.prng_random_bits mask + 1/(1-p) scaling) is not implemented here.
    # Linear 2 -> lane-dense 128-wide logits block (unmasked vector stores).
    logits = jnp.dot(h.astype(jnp.bfloat16), w2_ref[...],
                     preferred_element_type=jnp.float32)
    logits_ref[...] = logits + b2_ref[...]


@jax.jit
def mnist_forward(pixel_values, labels, w1, b1, w2, b2):
    """Mirrors MNISTModel.forward (eval mode). Returns {'loss', 'logits'}."""
    pixel_values = pixel_values.astype(jnp.float32)
    B = pixel_values.shape[0]
    x = pixel_values.reshape(B, -1)                      # nn.Flatten on NCHW
    assert x.shape[1] == IN_FEATURES

    # Batch tile: large enough to feed the MXU / pipeline DMA, bounded so
    # 2x (TB, 896) bf16 input buffers + resident weights + (TB, 128) f32 output
    # buffers stay tiny relative to VMEM on every generation (incl. v7x 64 MiB).
    TB = 512 if B >= 512 else max(8, _round_up(B, 8))
    B_pad = _round_up(B, TB)

    # Zero-pad K to 896 and batch to a whole number of tiles; cast the matmul
    # operands to bf16 (halves the dominant HBM traffic, f32 accumulation).
    x_p = jnp.zeros((B_pad, K_PAD), jnp.bfloat16).at[:B, :IN_FEATURES].set(
        x.astype(jnp.bfloat16))
    w1_p = jnp.zeros((K_PAD, HIDDEN), jnp.bfloat16).at[:IN_FEATURES, :].set(
        w1.astype(jnp.bfloat16))
    w2_p = jnp.zeros((HIDDEN, OUT_PAD), jnp.bfloat16).at[:, :NUM_LABELS].set(
        w2.astype(jnp.bfloat16))
    b1_p = b1.reshape(1, HIDDEN).astype(jnp.float32)
    b2_p = jnp.zeros((1, OUT_PAD), jnp.float32).at[0, :NUM_LABELS].set(
        b2.astype(jnp.float32))

    flops = 2 * B_pad * (K_PAD * HIDDEN + HIDDEN * OUT_PAD)
    bytes_accessed = (x_p.size * 2 + w1_p.size * 2 + w2_p.size * 2
                      + (b1_p.size + b2_p.size) * 4 + B_pad * OUT_PAD * 4)

    logits_pad = pl.pallas_call(
        _mlp_kernel,
        out_shape=jax.ShapeDtypeStruct((B_pad, OUT_PAD), jnp.float32),
        grid_spec=pltpu.PrefetchScalarGridSpec(
            num_scalar_prefetch=0,
            grid=(B_pad // TB,),
            in_specs=[
                pl.BlockSpec((TB, K_PAD), lambda i: (i, 0)),        # x tile
                pl.BlockSpec((K_PAD, HIDDEN), lambda i: (0, 0)),    # W1 resident
                pl.BlockSpec((1, HIDDEN), lambda i: (0, 0)),        # b1 resident
                pl.BlockSpec((HIDDEN, OUT_PAD), lambda i: (0, 0)),  # W2 resident
                pl.BlockSpec((1, OUT_PAD), lambda i: (0, 0)),       # b2 resident
            ],
            out_specs=pl.BlockSpec((TB, OUT_PAD), lambda i: (i, 0)),
        ),
        compiler_params=pltpu.CompilerParams(
            dimension_semantics=("parallel",)),
        cost_estimate=pl.CostEstimate(
            flops=flops, transcendentals=0, bytes_accessed=bytes_accessed),
    )(x_p, w1_p, b1_p, w2_p, b2_p)

    logits = logits_pad[:B, :NUM_LABELS]

    loss = None
    if labels is not None:
        lbl = labels.reshape(-1).astype(jnp.int32)
        lse = jax.scipy.special.logsumexp(logits, axis=-1)
        picked = jnp.take_along_axis(logits, lbl[:, None], axis=-1)[:, 0]
        loss = jnp.mean(lse - picked)        # CrossEntropyLoss, reduction='mean'
    return {"loss": loss, "logits": logits}


def init_params(key):
    """Deterministic init matching PyTorch nn.Linear default U(-1/sqrt(fan_in), +)."""
    k1, k2, k3, k4 = jax.random.split(key, 4)
    bound1 = 1.0 / jnp.sqrt(IN_FEATURES)
    bound2 = 1.0 / jnp.sqrt(HIDDEN)
    w1 = jax.random.uniform(k1, (IN_FEATURES, HIDDEN), jnp.float32, -bound1, bound1)
    b1 = jax.random.uniform(k2, (HIDDEN,), jnp.float32, -bound1, bound1)
    w2 = jax.random.uniform(k3, (HIDDEN, NUM_LABELS), jnp.float32, -bound2, bound2)
    b2 = jax.random.uniform(k4, (NUM_LABELS,), jnp.float32, -bound2, bound2)
    return w1, b1, w2, b2


if __name__ == "__main__":
    key = jax.random.PRNGKey(0)
    kp, kx, kl = jax.random.split(key, 3)

    w1, b1, w2, b2 = init_params(kp)

    B = 8
    pixel_values = jax.random.uniform(kx, (B, 1, 28, 28), jnp.float32)  # NCHW
    labels = jax.random.randint(kl, (B,), 0, NUM_LABELS, jnp.int32)

    out = mnist_forward(pixel_values, labels, w1, b1, w2, b2)
    jax.block_until_ready(out)

    # Reference with the same bf16-operand / f32-accumulation matmul recipe.
    x = pixel_values.reshape(B, -1)
    h_ref = jnp.maximum(
        jnp.dot(x.astype(jnp.bfloat16), w1.astype(jnp.bfloat16),
                preferred_element_type=jnp.float32) + b1, 0.0)
    logits_ref = jnp.dot(h_ref.astype(jnp.bfloat16), w2.astype(jnp.bfloat16),
                         preferred_element_type=jnp.float32) + b2
    lse = jax.scipy.special.logsumexp(logits_ref, axis=-1)
    loss_ref = jnp.mean(lse - logits_ref[jnp.arange(B), labels])

    assert jnp.allclose(out["logits"], logits_ref, atol=2e-2, rtol=2e-2)
    assert jnp.allclose(out["loss"], loss_ref, atol=2e-2, rtol=2e-2)

    print("KERNEL_OK")
</pallas_src>

<mosaic_0001>
module attributes {stable_mosaic.version = 11 : i64} {
  func.func @_mlp_kernel(%arg0: i32, %arg1: memref<8x896xbf16, #tpu.memory_space<vmem>>, %arg2: memref<896x128xbf16, #tpu.memory_space<vmem>>, %arg3: memref<1x128xf32, #tpu.memory_space<vmem>>, %arg4: memref<128x128xbf16, #tpu.memory_space<vmem>>, %arg5: memref<1x128xf32, #tpu.memory_space<vmem>>, %arg6: memref<8x128xf32, #tpu.memory_space<vmem>>) attributes {dimension_semantics = [#tpu.dimension_semantics<parallel>], iteration_bounds = array<i64: 1>, scalar_prefetch = 0 : i64, scratch_operands = 0 : i64, tpu.core_type = #tpu.core_type<tc>, window_params = [{transform_indices = @transform_0, window_bounds = array<i64: 8, 896>}, {pipeline_mode = #tpu.pipeline_mode<synchronous>, transform_indices = @transform_1, window_bounds = array<i64: 896, 128>}, {pipeline_mode = #tpu.pipeline_mode<synchronous>, transform_indices = @transform_2, window_bounds = array<i64: 1, 128>}, {pipeline_mode = #tpu.pipeline_mode<synchronous>, transform_indices = @transform_3, window_bounds = array<i64: 128, 128>}, {pipeline_mode = #tpu.pipeline_mode<synchronous>, transform_indices = @transform_4, window_bounds = array<i64: 1, 128>}, {transform_indices = @transform_5, window_bounds = array<i64: 8, 128>}]} {
    %c0 = arith.constant 0 : index
    %c0_0 = arith.constant 0 : index
    %0 = vector.load %arg1[%c0, %c0_0] : memref<8x896xbf16, #tpu.memory_space<vmem>>, vector<8x896xbf16>
    %c0_1 = arith.constant 0 : index
    %c0_2 = arith.constant 0 : index
    %1 = vector.load %arg2[%c0_1, %c0_2] : memref<896x128xbf16, #tpu.memory_space<vmem>>, vector<896x128xbf16>
    %cst = arith.constant dense<0.000000e+00> : vector<8x128xf32>
    %2 = tpu.matmul %0, %1, %cst {dimension_numbers = #tpu.dot_dimension_numbers<[1], [0], [0], [1], [0, 0, 1, 1], [], []>} : vector<8x896xbf16>, vector<896x128xbf16>, vector<8x128xf32> -> vector<8x128xf32>
    %c0_3 = arith.constant 0 : index
    %c0_4 = arith.constant 0 : index
    %3 = vector.load %arg3[%c0_3, %c0_4] : memref<1x128xf32, #tpu.memory_space<vmem>>, vector<1x128xf32>
    %4 = vector.broadcast %3 : vector<1x128xf32> to vector<8x128xf32>
    %5 = arith.addf %2, %4 : vector<8x128xf32>
    %cst_5 = arith.constant 0.000000e+00 : f32
    %6 = vector.broadcast %cst_5 : f32 to vector<8x128xf32>
    %7 = arith.maximumf %5, %6 : vector<8x128xf32>
    %8 = arith.truncf %7 : vector<8x128xf32> to vector<8x128xbf16>
    %c0_6 = arith.constant 0 : index
    %c0_7 = arith.constant 0 : index
    %9 = vector.load %arg4[%c0_6, %c0_7] : memref<128x128xbf16, #tpu.memory_space<vmem>>, vector<128x128xbf16>
    %cst_8 = arith.constant dense<0.000000e+00> : vector<8x128xf32>
    %10 = tpu.matmul %8, %9, %cst_8 {dimension_numbers = #tpu.dot_dimension_numbers<[1], [0], [0], [1], [0, 0, 1, 1], [], []>} : vector<8x128xbf16>, vector<128x128xbf16>, vector<8x128xf32> -> vector<8x128xf32>
    %c0_9 = arith.constant 0 : index
    %c0_10 = arith.constant 0 : index
    %11 = vector.load %arg5[%c0_9, %c0_10] : memref<1x128xf32, #tpu.memory_space<vmem>>, vector<1x128xf32>
    %12 = vector.broadcast %11 : vector<1x128xf32> to vector<8x128xf32>
    %13 = arith.addf %10, %12 : vector<8x128xf32>
    %c0_11 = arith.constant 0 : index
    %c0_12 = arith.constant 0 : index
    %14 = vector.load %arg6[%c0_11, %c0_12] : memref<8x128xf32, #tpu.memory_space<vmem>>, vector<8x128xf32>
    tpu.vector_store %arg6[%c0_11, %c0_12], %13 {strides = array<i32>} : memref<8x128xf32, #tpu.memory_space<vmem>>, vector<8x128xf32>,
    return
  }
  func.func @transform_0(%arg0: i32) -> (i32, i32) {
    %c0_i32 = arith.constant 0 : i32
    %c0_i32_0 = arith.constant 0 : i32
    return %arg0, %c0_i32 : i32, i32
  }
  func.func @transform_1(%arg0: i32) -> (i32, i32) {
    %c0_i32 = arith.constant 0 : i32
    %c0_i32_0 = arith.constant 0 : i32
    %c0_i32_1 = arith.constant 0 : i32
    return %c0_i32, %c0_i32_0 : i32, i32
  }
  func.func @transform_2(%arg0: i32) -> (i32, i32) {
    %c0_i32 = arith.constant 0 : i32
    %c0_i32_0 = arith.constant 0 : i32
    %c0_i32_1 = arith.constant 0 : i32
    return %c0_i32, %c0_i32_0 : i32, i32
  }
  func.func @transform_3(%arg0: i32) -> (i32, i32) {
    %c0_i32 = arith.constant 0 : i32
    %c0_i32_0 = arith.constant 0 : i32
    %c0_i32_1 = arith.constant 0 : i32
    return %c0_i32, %c0_i32_0 : i32, i32
  }
  func.func @transform_4(%arg0: i32) -> (i32, i32) {
    %c0_i32 = arith.constant 0 : i32
    %c0_i32_0 = arith.constant 0 : i32
    %c0_i32_1 = arith.constant 0 : i32
    return %c0_i32, %c0_i32_0 : i32, i32
  }
  func.func @transform_5(%arg0: i32) -> (i32, i32) {
    %c0_i32 = arith.constant 0 : i32
    %c0_i32_0 = arith.constant 0 : i32
    return %arg0, %c0_i32 : i32, i32
  }
}

</mosaic_0001>

<bundles_post_ra>
// kernel: mnist_forward.1
= control target key start
LH: loop header
LB: loop body
LE: loop exit
PB: predicated region body
PF: predicated region fallthrough
CT: control target
= control target key end

     0   :  { %v1053_v39 = vmov 0.0   ;;  %vm1054_vm0 = vmmov 0   ;;  %s1318_s1 = inlined_call_operand.vmem [shape: bf16[896,128], index: 1, kind: input, shape index: {}]   ;;  %s1319_s0 = inlined_call_operand.vmem [shape: bf16[8,896], index: 0, kind: input, shape index: {}]   ;;  %s1320_s3 = inlined_call_operand.vmem [shape: bf16[128,128], index: 3, kind: input, shape index: {}]   ;;  %s1321_s2 = inlined_call_operand.vmem [shape: f32[1,128], index: 2, kind: input, shape index: {}]   ;;  %s1322_s4 = inlined_call_operand.vmem [shape: f32[1,128], index: 4, kind: input, shape index: {}]   ;;  %s1323_s5 = inlined_call_operand.vmem [shape: f32[8,128], index: 5, kind: output, shape index: {}]  }
   0x1   :  { %v982_v0 = vld [vmem:[%s1318_s1 + $0x78] sm:$0xff]   ;;  %v986_v4 = vld [vmem:[%s1318_s1 + $0x70] sm:$0xff]   ;;  %v990_v8 = vld [vmem:[%s1318_s1 + $0x68] sm:$0xff]  }
   0x2   :  { %v983_v1 = vld [vmem:[%s1318_s1 + $0xf8] sm:$0xff]   ;;  %856 = vmatprep.subr.bf16.mxu0 %v982_v0  ;;  %v987_v5 = vld [vmem:[%s1318_s1 + $0xf0] sm:$0xff]   ;;  %v991_v9 = vld [vmem:[%s1318_s1 + $0xe8] sm:$0xff]  }
   0x3   :  { %v984_v2 = vld [vmem:[%s1318_s1 + $0x38] sm:$0xff]   ;;  %878 = vmatprep.subr.bf16.mxu1 %v983_v1  ;;  %v988_v6 = vld [vmem:[%s1318_s1 + $0x30] sm:$0xff]   ;;  %v992_v10 = vld [vmem:[%s1318_s1 + $0x28] sm:$0xff]  }
   0x4   :  { %v985_v3 = vld [vmem:[%s1318_s1 + $0xb8] sm:$0xff]   ;;  %857 = vmatpush3.bf16.msra.mxu0 %v984_v2  ;;  %v989_v7 = vld [vmem:[%s1318_s1 + $0xb0] sm:$0xff]   ;;  %v993_v11 = vld [vmem:[%s1318_s1 + $0xa8] sm:$0xff]  }
   0x5   :  { %879 = vmatpush3.bf16.msra.mxu1 %v985_v3  ;;  %858 = vmatprep.subr.bf16.mxu0 %v986_v4  ;;  %v994_v12 = vld [vmem:[%s1318_s1 + $0x60] sm:$0xff]   ;;  %v998_v16 = vld [vmem:[%s1318_s1 + $0x58] sm:$0xff]   ;;  %v1002_v20 = vld [vmem:[%s1318_s1 + $0x50] sm:$0xff]  }
   0x6   :  { %880 = vmatprep.subr.bf16.mxu1 %v987_v5  ;;  %v995_v13 = vld [vmem:[%s1318_s1 + $0xe0] sm:$0xff]   ;;  %v999_v17 = vld [vmem:[%s1318_s1 + $0xd8] sm:$0xff]   ;;  %v1003_v21 = vld [vmem:[%s1318_s1 + $0xd0] sm:$0xff]  }
   0x7   :  { %v996_v14 = vld [vmem:[%s1318_s1 + $0x20] sm:$0xff]   ;;  %v1000_v18 = vld [vmem:[%s1318_s1 + $0x18] sm:$0xff]   ;;  %v1004_v22 = vld [vmem:[%s1318_s1 + $0x10] sm:$0xff]  }
   0x8   :  { %859 = vmatpush3.bf16.msra.mxu0 %v988_v6  ;;  %v997_v15 = vld [vmem:[%s1318_s1 + $0xa0] sm:$0xff]   ;;  %v1001_v19 = vld [vmem:[%s1318_s1 + $0x98] sm:$0xff]   ;;  %v1005_v23 = vld [vmem:[%s1318_s1 + $0x90] sm:$0xff]  }
   0x9   :  { %881 = vmatpush3.bf16.msra.mxu1 %v989_v7  ;;  %860 = vmatprep.subr.bf16.mxu0 %v990_v8  ;;  %v1006_v24 = vld [vmem:[%s1318_s1 + $0x48] sm:$0xff]   ;;  %v1010_v28 = vld [vmem:[%s1318_s1 + $0x40] sm:$0xff]   ;;  %v1018_v38 = vld [vmem:[%s1318_s1 + $0x178] sm:$0xff]  }
   0xa   :  { %882 = vmatprep.subr.bf16.mxu1 %v991_v9  ;;  %v1007_v25 = vld [vmem:[%s1318_s1 + $0xc8] sm:$0xff]   ;;  %v1011_v29 = vld [vmem:[%s1318_s1 + $0xc0] sm:$0xff]   ;;  %v1019_v40 = vld [vmem:[%s1318_s1 + $0x138] sm:$0xff]  }
   0xb   :  { %v1008_v26 = vld [vmem:[%s1318_s1 + $0x8] sm:$0xff]   ;;  %v1012_v30 = vld [vmem:[%s1318_s1] sm:$0xff]   ;;  %v1020_v41 = vld [vmem:[%s1318_s1 + $0x1b8] sm:$0xff]  }
   0xc   :  { %861 = vmatpush3.bf16.msra.mxu0 %v992_v10  ;;  %v1009_v27 = vld [vmem:[%s1318_s1 + $0x88] sm:$0xff]   ;;  %v1013_v31 = vld [vmem:[%s1318_s1 + $0x80] sm:$0xff]   ;;  %v1021_v42 = vld [vmem:[%s1318_s1 + $0x170] sm:$0xff]  }
   0xd   :  { %883 = vmatpush3.bf16.msra.mxu1 %v993_v11  ;;  %862 = vmatprep.subr.bf16.mxu0 %v994_v12  ;;  %v21_v32 = vld [vmem:[%s1319_s0] sm:$0xff]  ;;  %v22_v33 = vld [vmem:[%s1319_s0 + $0x8] sm:$0xff]  ;;  %v1022_v43 = vld [vmem:[%s1318_s1 + $0x130] sm:$0xff]  }
   0xe   :  { %884 = vmatprep.subr.bf16.mxu1 %v995_v13  ;;  %v784_v34 = vcombine.low %v21_v32, %v21_v32  ;;  %v785_v35 = vcombine.high %v21_v32, %v21_v32  ;;  %v786_v36 = vcombine.low %v22_v33, %v22_v33  ;;  %v787_v37 = vcombine.high %v22_v33, %v22_v33  ;;  %v1023_v44 = vld [vmem:[%s1318_s1 + $0x1b0] sm:$0xff]   ;;  %v1024_v45 = vld [vmem:[%s1318_s1 + $0x168] sm:$0xff]   ;;  %v1027_v48 = vld [vmem:[%s1318_s1 + $0x160] sm:$0xff]  }
   0xf   :  { %v1025_v46 = vld [vmem:[%s1318_s1 + $0x128] sm:$0xff]   ;;  %v1028_v49 = vld [vmem:[%s1318_s1 + $0x120] sm:$0xff]   ;;  %v1030_v51 = vld [vmem:[%s1318_s1 + $0x158] sm:$0xff]  }
  0x10   :  { %863 = vmatpush3.bf16.msra.mxu0 %v996_v14  ;;  %537 = vmatprep.mubr.bf16.mxu0 %v785_v35  ;;  %v1026_v47 = vld [vmem:[%s1318_s1 + $0x1a8] sm:$0xff]   ;;  %v1029_v50 = vld [vmem:[%s1318_s1 + $0x1a0] sm:$0xff]   ;;  %v1031_v52 = vld [vmem:[%s1318_s1 + $0x118] sm:$0xff]  }
  0x11   :  { %885 = vmatpush3.bf16.msra.mxu1 %v997_v15  ;;  %864 = vmatprep.subr.bf16.mxu0 %v998_v16  ;;  %v1032_v53 = vld [vmem:[%s1318_s1 + $0x198] sm:$0xff]   ;;  %v1033_v54 = vld [vmem:[%s1318_s1 + $0x150] sm:$0xff]   ;;  %v1036_v57 = vld [vmem:[%s1318_s1 + $0x148] sm:$0xff]  }
  0x12   :  { %886 = vmatprep.subr.bf16.mxu1 %v999_v17  ;;  %577 = vmatprep.mubr.bf16.mxu1 %v787_v37  ;;  %v1034_v55 = vld [vmem:[%s1318_s1 + $0x110] sm:$0xff]   ;;  %v1037_v59 = vld [vmem:[%s1318_s1 + $0x108] sm:$0xff]   ;;  %v1039_v62 = vld [vmem:[%s1318_s1 + $0x140] sm:$0xff]  }
  0x13   :  { %v1035_v56 = vld [vmem:[%s1318_s1 + $0x190] sm:$0xff]   ;;  %v1038_v61 = vld [vmem:[%s1318_s1 + $0x188] sm:$0xff]   ;;  %v1040_v63 = vld [vmem:[%s1318_s1 + $0x100] sm:$0xff]  }
  0x14   :  { %865 = vmatpush3.bf16.msra.mxu0 %v1000_v18  ;;  %v23_v58 = vld [vmem:[%s1319_s0 + $0x10] sm:$0xff]  ;;  %v1041_v0 = vld [vmem:[%s1318_s1 + $0x180] sm:$0xff]   ;;  %v1044_v2 = vld [vmem:[%s1319_s0 + $0x18] ss:$0 sps:$4 sm:$0xff]  }
  0x15   :  { %887 = vmatpush3.bf16.msra.mxu1 %v1001_v19  ;;  %866 = vmatprep.subr.bf16.mxu0 %v1002_v20  ;;  %v789_v60 = vcombine.high %v23_v58, %v23_v58  ;;  %v788_v1 = vcombine.low %v23_v58, %v23_v58  ;;  %v1045_v3 = vld [vmem:[%s1320_s3 + $0x38] sm:$0xff]   ;;  %v1046_v4 = vld [vmem:[%s1320_s3 + $0x30] sm:$0xff]   ;;  %v1047_v5 = vld [vmem:[%s1320_s3 + $0x28] sm:$0xff]  }
  0x16   :  { %888 = vmatprep.subr.bf16.mxu1 %v1003_v21  ;;  %v1048_v6 = vld [vmem:[%s1320_s3 + $0x20] sm:$0xff]   ;;  %v1049_v7 = vld [vmem:[%s1320_s3 + $0x18] sm:$0xff]   ;;  %v1050_v8 = vld [vmem:[%s1320_s3 + $0x10] sm:$0xff]  }
  0x17   :  { %v1051_v9 = vld [vmem:[%s1320_s3 + $0x8] sm:$0xff]   ;;  %v1052_v10 = vld [vmem:[%s1320_s3] sm:$0xff]  }
  0x18   :  { %867 = vmatpush3.bf16.msra.mxu0 %v1004_v22  ;;  %v783_v20 = vld [vmem:[%s1321_s2] ss:$0 sm:$0xff] }
  0x19   :  { %889 = vmatpush3.bf16.msra.mxu1 %v1005_v23  ;;  %868 = vmatprep.subr.bf16.mxu0 %v1006_v24  ;;  %v847_v37 = vld [vmem:[%s1322_s4] ss:$0 sm:$0xff] }
  0x1a   :  { %890 = vmatprep.subr.bf16.mxu1 %v1007_v25 }
  0x1c   :  { %869 = vmatpush3.bf16.msra.mxu0 %v1008_v26 }
  0x1d   :  { %891 = vmatpush3.bf16.msra.mxu1 %v1009_v27  ;;  %870 = vmatprep.subr.bf16.mxu0 %v1010_v28 }
  0x1e   :  { %892 = vmatprep.subr.bf16.mxu1 %v1011_v29 }
  0x20   :  { %871 = vmatpush3.bf16.msra.mxu0 %v1012_v30 }
  0x21   :  { %893 = vmatpush3.bf16.msra.mxu1 %v1013_v31  ;;  %900 = vmatprep.subr.bf16.mxu0 %v1018_v38 }
  0x22   :  { %940 = vmatprep.subr.bf16.mxu1 %v1053_v39 }
  0x23   :  { %538 = vmatmul.mubr.bf16.vlgmr.msra.gmra.mxu0 %v784_v34 }
  0x24   :  { %578 = vmatmul.mubr.bf16.vlgmr.msra.gmra.mxu1 %v786_v36  ;;  %901 = vmatpush3.bf16.msra.mxu0 %v1019_v40 }
  0x25   :  { %941 = vmatpush3.bf16.msra.mxu1 %v1020_v41  ;;  %902 = vmatprep.subr.bf16.mxu0 %v1021_v42 }
  0x26   :  { %942 = vmatprep.subr.bf16.mxu1 %v1053_v39  ;;  %956 = vmatprep.mubr.msk.bf16.mxu1 %vm1054_vm0, %v1053_v39 }
  0x27   :  { %617 = vmatprep.mubr.bf16.mxu0 %v789_v60 }
  0x28   :  { %903 = vmatpush3.bf16.msra.mxu0 %v1022_v43 }
  0x29   :  { %943 = vmatpush3.bf16.msra.mxu1 %v1023_v44  ;;  %904 = vmatprep.subr.bf16.mxu0 %v1024_v45 }
  0x2a   :  { %944 = vmatprep.subr.bf16.mxu1 %v1053_v39 }
  0x2c   :  { %905 = vmatpush3.bf16.msra.mxu0 %v1025_v46 }
  0x2d   :  { %945 = vmatpush3.bf16.msra.mxu1 %v1026_v47  ;;  %906 = vmatprep.subr.bf16.mxu0 %v1027_v48 }
  0x2e   :  { %946 = vmatprep.subr.bf16.mxu1 %v1053_v39 }
  0x30   :  { %907 = vmatpush3.bf16.msra.mxu0 %v1028_v49 }
  0x31   :  { %947 = vmatpush3.bf16.msra.mxu1 %v1029_v50  ;;  %908 = vmatprep.subr.bf16.mxu0 %v1030_v51 }
  0x32   :  { %948 = vmatprep.subr.bf16.mxu1 %v1053_v39 }
  0x34   :  { %909 = vmatpush3.bf16.msra.mxu0 %v1031_v52 }
  0x35   :  { %949 = vmatpush3.bf16.msra.mxu1 %v1032_v53  ;;  %910 = vmatprep.subr.bf16.mxu0 %v1033_v54 }
  0x36   :  { %950 = vmatprep.subr.bf16.mxu1 %v1053_v39 }
  0x38   :  { %911 = vmatpush3.bf16.msra.mxu0 %v1034_v55 }
  0x39   :  { %951 = vmatpush3.bf16.msra.mxu1 %v1035_v56  ;;  %912 = vmatprep.subr.bf16.mxu0 %v1036_v57 }
  0x3a   :  { %952 = vmatprep.subr.bf16.mxu1 %v1053_v39 }
  0x3c   :  { %913 = vmatpush3.bf16.msra.mxu0 %v1037_v59 }
  0x3d   :  { %953 = vmatpush3.bf16.msra.mxu1 %v1038_v61  ;;  %914 = vmatprep.subr.bf16.mxu0 %v1039_v62 }
  0x3e   :  { %954 = vmatprep.subr.bf16.mxu1 %v1053_v39 }
  0x40   :  { %915 = vmatpush3.bf16.msra.mxu0 %v1040_v63 }
  0x41   :  { %955 = vmatpush3.bf16.msra.mxu1 %v1041_v0  ;;  %960 = vmatprep.subr.bf16.mxu0 %v1053_v39 }
  0x43   :  { %618 = vmatmul.mubr.bf16.vlgmr.msra.gmra.mxu0 %v788_v1 }
  0x44   :  { %957 = vmatmul.mubr.bf16.vlgmr.msra.gmra.mxu1 %v1044_v2  ;;  %976 = vmatprep.mubr.msk.bf16.mxu0 %vm1054_vm0, %v1053_v39 }
  0x45   :  { %961 = vmatpush3.bf16.msra.mxu0 %v1045_v3 }
  0x46   :  { %962 = vmatprep.subr.bf16.mxu0 %v1053_v39 }
  0x49   :  { %963 = vmatpush3.bf16.msra.mxu0 %v1046_v4 }
  0x4a   :  { %964 = vmatprep.subr.bf16.mxu0 %v1053_v39 }
  0x4d   :  { %965 = vmatpush3.bf16.msra.mxu0 %v1047_v5 }
  0x4e   :  { %966 = vmatprep.subr.bf16.mxu0 %v1053_v39 }
  0x51   :  { %967 = vmatpush3.bf16.msra.mxu0 %v1048_v6 }
  0x52   :  { %968 = vmatprep.subr.bf16.mxu0 %v1053_v39 }
  0x55   :  { %969 = vmatpush3.bf16.msra.mxu0 %v1049_v7 }
  0x56   :  { %970 = vmatprep.subr.bf16.mxu0 %v1053_v39 }
  0x59   :  { %971 = vmatpush3.bf16.msra.mxu0 %v1050_v8 }
  0x5a   :  { %972 = vmatprep.subr.bf16.mxu0 %v1053_v39 }
  0x5d   :  { %973 = vmatpush3.bf16.msra.mxu0 %v1051_v9 }
  0x5e   :  { %974 = vmatprep.subr.bf16.mxu0 %v1053_v39 }
  0x61   :  { %975 = vmatpush3.bf16.msra.mxu0 %v1052_v10 }
  0xe3   :  { %v872_v11 = vpop.f32.mrf.mxu0 }
  0xe4   :  { %v894_v12 = vpop.f32.mrf.mxu1 }
  0xe5   :  { %v873_v13 = vpop.f32.mrf.mxu0 }
  0xe6   :  { %v895_v14 = vpop.f32.mrf.mxu1  ;;  %v874_v19 = vadd.f32 %v873_v13, %v872_v11 }
  0xe7   :  { %v875_v15 = vpop.f32.mrf.mxu0  ;;  %v896_v22 = vadd.f32 %v895_v14, %v894_v12 }
  0xe8   :  { %v897_v16 = vpop.f32.mrf.mxu1  ;;  %v540_v21 = vadd.f32 %v874_v19, %v783_v20 }
  0xe9   :  { %v876_v17 = vpop.f32.mrf.mxu0 }
  0xea   :  { %v898_v18 = vpop.f32.mrf.mxu1  ;;  %v580_v26 = vadd.f32 %v896_v22, %v540_v21 }
 0x103   :  { %v916_v23 = vpop.f32.mrf.mxu0 }
 0x104   :  { %v659_v24 = vpop.f32.mrf.mxu1 }
 0x105   :  { %v917_v25 = vpop.f32.mrf.mxu0 }
 0x106   :  { %v918_v27 = vadd.f32 %v917_v25, %v916_v23  ;;  %v958_v28 = vpop.f32.mrf.mxu1 }
 0x107   :  { %v919_v29 = vpop.f32.mrf.mxu0 }
 0x108   :  { %v620_v30 = vadd.f32 %v918_v27, %v580_v26  ;;  %v662_v31 = vpop.f32.mrf.mxu1 }
 0x109   :  { %v920_v32 = vpop.f32.mrf.mxu0 }
 0x10a   :  { %v660_v33 = vadd.f32 %v659_v24, %v620_v30  ;;  %v959_v34 = vpop.f32.mrf.mxu1 }
 0x10c   :  { %v665_v35 = vmax.f32 %v660_v33, 0.0 }
 0x10e   :  { %v666_v36 = vpack.c.bf16 %v665_v35, %v665_v35 }
 0x110   :  { %977 = vmatmul.mubr.bf16.vlgmr.msra.gmra.mxu0 %v666_v36 }
 0x1d0   :  { %v772_v38 = vpop.f32.mrf.mxu0 }
 0x1d1   :  { %v773_v39 = vadd.f32 %v847_v37, %v772_v38 }
 0x1d2   :  { %v978_v40 = vpop.f32.mrf.mxu0 }
 0x1d3   :  { %778 = vst [vmem:[%s1323_s5] sm:$0xff] %v773_v39 }
 0x1d4   :  { %v775_v41 = vpop.f32.mrf.mxu0 }
 0x1d6   :  { %v979_v42 = vpop.f32.mrf.mxu0 }

</bundles_post_ra>
